<compile_context>
chip_gen: v6e
topology: v6e:2x2x1
jax: 0.10.0
libtpu: 0.0.40
codegen_flags: <defaults>
</compile_context>

<pallas_src>
import numpy as np
import jax
import jax.numpy as jnp
from jax.experimental import pallas as pl
from jax.experimental.pallas import tpu as pltpu


def _round_up(x: int, m: int) -> int:
    return -(-x // m) * m


def nested_dropout_kernel(mask_ref, x_ref, o_ref):
    # mask_ref: (1, tc) in x.dtype — precomputed lane-dense nested-dropout mask
    # x_ref, o_ref: (tr, tc)
    o_ref[...] = x_ref[...] * mask_ref[...]


def _chip_params():
    """Return (target_tile_bytes, dual_tensorcore) per TPU generation."""
    kind = ""
    try:
        kind = jax.devices()[0].device_kind.lower()
    except Exception:
        pass
    if "v7" in kind:
        # 3.2 TB/s HBM: amortize per-step overhead with bigger tiles; 2 TCs.
        return 6 * 1024 * 1024, True
    if "v6" in kind:
        return 4 * 1024 * 1024, False
    if "v5p" in kind or "v4" in kind:
        return 3 * 1024 * 1024, True          # megacore chips
    # v5e / unknown: 2 MiB already amortizes well at ~0.8 TB/s HBM.
    return 2 * 1024 * 1024, False


def _choose_tiles(L: int, BC: int, dsize: int, target_bytes: int, dual_tc: bool):
    """Pick (tile_rows, tile_cols) ~target_bytes, respecting (8,128)/packing rules."""
    # packed sublane count per vreg: 8 for f32, 16 for bf16, 32 for int8/fp8
    sub = max(8, 32 // max(1, dsize))
    min_tr = L if L < sub else sub
    # widest lane-dense column tile that keeps min_tr rows under the byte target
    col_budget = max(128, target_bytes // max(1, min_tr * dsize))
    if BC <= col_budget:
        tc = BC                                    # full array dim -> legal, lane-dense
    else:
        tc = max(128, (col_budget // 128) * 128)   # multiple of 128
    # rows: fill the byte budget
    tr = max(min_tr, target_bytes // max(1, tc * dsize))
    if L <= sub:
        tr = L                                     # full first dim -> always legal
    else:
        tr = max(sub, (tr // sub) * sub)
        if tr >= L:
            tr = L                                 # one full-height block, no padding
        if dual_tc and tc >= BC and tr == L:
            # whole array fits in one tile: keep >=4 row steps so each of the
            # two TensorCores gets >=2 pipeline steps (steady-state overlap).
            step = _round_up(pl.cdiv(L, 4), sub)
            if step < L:
                tr = max(sub, step)
    return tr, tc


def nested_dropout(x: jax.Array, chosen_idxs: jax.Array, *, training: bool = True,
                   donate_x: bool = False) -> jax.Array:
    """Apply nested dropout. chosen_idxs: (B,) int cutoffs (values in [0, C))."""
    if not training:
        return x
    ori_shape = x.shape
    if x.ndim < 2:
        x = x[None]
    B, C = int(x.shape[-2]), int(x.shape[-1])
    L = 1
    for d in x.shape[:-2]:
        L *= int(d)
    BC = B * C
    x2 = x.reshape(L, BC)  # layout-preserving reshape

    # Precompute the lane-dense mask once (glue): mask_flat[b*C + c] = (c <= idx_b).
    # NOTE: chosen_idxs must lie in [0, C) (as guaranteed by the sampler below).
    idx = chosen_idxs.astype(jnp.int32)
    mask = (jnp.arange(C, dtype=jnp.int32)[None, :] <= idx[:, None]).astype(x.dtype)
    mask2 = mask.reshape(1, BC)

    dsize = jnp.dtype(x.dtype).itemsize
    target_bytes, dual_tc = _chip_params()
    tr, tc = _choose_tiles(L, BC, dsize, target_bytes, dual_tc)
    n_row = pl.cdiv(L, tr)
    n_col = pl.cdiv(BC, tc)

    if n_col == 1:
        # Common case: whole width in one lane-dense tile.  1-D grid over rows
        # so the parallel axis has extent > 1 for megacore / dual-TC sharding;
        # mask block index is constant -> stays resident in VMEM.
        grid = (n_row,)
        mask_spec = pl.BlockSpec((1, tc), lambda i: (0, 0))
        x_spec = pl.BlockSpec((tr, tc), lambda i: (i, 0))
        out_spec = pl.BlockSpec((tr, tc), lambda i: (i, 0))
        dim_sem = ("parallel",)
    else:
        # Columns outer, rows inner: the mask tile's block index is constant
        # across the inner row sweep, so it stays resident in VMEM.
        grid = (n_col, n_row)
        mask_spec = pl.BlockSpec((1, tc), lambda j, i: (0, j))
        x_spec = pl.BlockSpec((tr, tc), lambda j, i: (i, j))
        out_spec = pl.BlockSpec((tr, tc), lambda j, i: (i, j))
        dim_sem = ("parallel", "parallel")

    # Explicit VMEM budget derived from the tiles (double-buffered in + out,
    # plus the resident mask and headroom); portable across scoped defaults.
    tile_bytes = tr * tc * dsize
    mask_bytes = tc * dsize
    vmem_limit = 4 * tile_bytes + 2 * mask_bytes + (2 << 20)
    vmem_limit = int(min(max(vmem_limit, 16 << 20), 48 << 20))

    out = pl.pallas_call(
        nested_dropout_kernel,
        out_shape=jax.ShapeDtypeStruct((L, BC), x.dtype),
        grid=grid,
        in_specs=[mask_spec, x_spec],
        out_specs=out_spec,
        input_output_aliases=({1: 0} if donate_x else {}),
        compiler_params=pltpu.CompilerParams(
            dimension_semantics=dim_sem,
            vmem_limit_bytes=vmem_limit),
    )(mask2, x2)
    return out.reshape(ori_shape)


def sample_chosen_idxs(key: jax.Array, batch_size: int, dim: int, probs=None) -> jax.Array:
    """Glue: sample cutoff indices in [0, dim).

    # TODO(synk): mirrors np.random.Generator.choice of the PyTorch module in
    # distribution only; it will not bit-reproduce the numpy RNG stream.
    """
    if probs is None:
        p = None
    else:
        p = jnp.asarray(probs, dtype=jnp.float32)
        p = p / jnp.sum(p)
    return jax.random.choice(key, dim, shape=(batch_size,), replace=True, p=p)


def nested_dropout_ref(x, chosen_idxs):
    """Pure-JAX reference for correctness check (mask uses c <= k_b, as in the spec)."""
    xs = x if x.ndim >= 2 else x[None]
    C = xs.shape[-1]
    mask = (jnp.arange(C)[None, :] <= chosen_idxs[:, None]).astype(xs.dtype)
    return (xs * mask).reshape(x.shape)


if __name__ == "__main__":
    key = jax.random.PRNGKey(0)
    kx1, kx2, kx3, kx4, ki1, ki2, ki3, ki4 = jax.random.split(key, 8)

    # 1) Main case: x: (*, B, C) with leading dims (2, 4), batch B = 8, C = 32.
    x1 = jax.random.normal(kx1, (2, 4, 8, 32), dtype=jnp.float32)
    C1 = x1.shape[-1]
    probs = np.arange(1, C1 + 1, dtype=np.float32)
    probs = probs / probs.sum()
    idx1 = sample_chosen_idxs(ki1, x1.shape[-2], C1, probs)
    y1 = jax.block_until_ready(nested_dropout(x1, idx1, training=True))
    np.testing.assert_allclose(np.asarray(y1), np.asarray(nested_dropout_ref(x1, idx1)),
                               rtol=0, atol=0)

    # 2) Odd, non-(8,128)-aligned shape: (3, 5, 20), uniform probs.
    x2 = jax.random.normal(kx2, (3, 5, 20), dtype=jnp.float32)
    idx2 = sample_chosen_idxs(ki2, x2.shape[-2], x2.shape[-1], None)
    y2 = jax.block_until_ready(nested_dropout(x2, idx2, training=True))
    np.testing.assert_allclose(np.asarray(y2), np.asarray(nested_dropout_ref(x2, idx2)),
                               rtol=0, atol=0)

    # 3) 1-D input (unsqueeze path, B = 1).
    x3 = jax.random.normal(kx3, (32,), dtype=jnp.float32)
    idx3 = sample_chosen_idxs(ki3, 1, x3.shape[-1], None)
    y3 = jax.block_until_ready(nested_dropout(x3, idx3, training=True))
    np.testing.assert_allclose(np.asarray(y3), np.asarray(nested_dropout_ref(x3, idx3)),
                               rtol=0, atol=0)

    # 4) bf16 input (exercises dtype-aware sublane packing) + donate_x alias path.
    x4 = jax.random.normal(kx4, (48, 4, 64), dtype=jnp.bfloat16)
    idx4 = sample_chosen_idxs(ki4, x4.shape[-2], x4.shape[-1], None)
    y4 = jax.block_until_ready(nested_dropout(x4, idx4, training=True, donate_x=True))
    np.testing.assert_allclose(np.asarray(y4).astype(np.float32),
                               np.asarray(nested_dropout_ref(x4, idx4)).astype(np.float32),
                               rtol=0, atol=0)

    # 5) Eval mode is the identity.
    y_eval = nested_dropout(x1, idx1, training=False)
    np.testing.assert_allclose(np.asarray(y_eval), np.asarray(x1), rtol=0, atol=0)

    print("KERNEL_OK")
</pallas_src>

<mosaic_0001>
module attributes {stable_mosaic.version = 11 : i64} {
  func.func @nested_dropout_kernel(%arg0: i32, %arg1: memref<1x256xf32, #tpu.memory_space<vmem>>, %arg2: memref<8x256xf32, #tpu.memory_space<vmem>>, %arg3: memref<8x256xf32, #tpu.memory_space<vmem>>) attributes {dimension_semantics = [#tpu.dimension_semantics<parallel>], iteration_bounds = array<i64: 1>, scalar_prefetch = 0 : i64, scratch_operands = 0 : i64, tpu.core_type = #tpu.core_type<tc>, window_params = [{pipeline_mode = #tpu.pipeline_mode<synchronous>, transform_indices = @transform_0, window_bounds = array<i64: 1, 256>}, {transform_indices = @transform_1, window_bounds = array<i64: 8, 256>}, {transform_indices = @transform_2, window_bounds = array<i64: 8, 256>}]} {
    %c0 = arith.constant 0 : index
    %c0_0 = arith.constant 0 : index
    %0 = vector.load %arg2[%c0, %c0_0] : memref<8x256xf32, #tpu.memory_space<vmem>>, vector<8x256xf32>
    %c0_1 = arith.constant 0 : index
    %c0_2 = arith.constant 0 : index
    %1 = vector.load %arg1[%c0_1, %c0_2] : memref<1x256xf32, #tpu.memory_space<vmem>>, vector<1x256xf32>
    %2 = vector.broadcast %1 : vector<1x256xf32> to vector<8x256xf32>
    %3 = arith.mulf %0, %2 : vector<8x256xf32>
    %c0_3 = arith.constant 0 : index
    %c0_4 = arith.constant 0 : index
    %4 = vector.load %arg3[%c0_3, %c0_4] : memref<8x256xf32, #tpu.memory_space<vmem>>, vector<8x256xf32>
    tpu.vector_store %arg3[%c0_3, %c0_4], %3 {strides = array<i32>} : memref<8x256xf32, #tpu.memory_space<vmem>>, vector<8x256xf32>,
    return
  }
  func.func @transform_0(%arg0: i32) -> (i32, i32) {
    %c0_i32 = arith.constant 0 : i32
    %c0_i32_0 = arith.constant 0 : i32
    %c0_i32_1 = arith.constant 0 : i32
    return %c0_i32, %c0_i32_0 : i32, i32
  }
  func.func @transform_1(%arg0: i32) -> (i32, i32) {
    %c0_i32 = arith.constant 0 : i32
    %c0_i32_0 = arith.constant 0 : i32
    return %arg0, %c0_i32 : i32, i32
  }
  func.func @transform_2(%arg0: i32) -> (i32, i32) {
    %c0_i32 = arith.constant 0 : i32
    %c0_i32_0 = arith.constant 0 : i32
    return %arg0, %c0_i32 : i32, i32
  }
}

</mosaic_0001>

<bundles_post_ra>
// kernel: tpu_custom_call.1
= control target key start
LH: loop header
LB: loop body
LE: loop exit
PB: predicated region body
PF: predicated region fallthrough
CT: control target
= control target key end

     0   :  { %7 = vsyncpa [#allocation3], 0  ;;  %s166_s0 = inlined_call_operand.hbm [shape: f32[1,256], index: 0, kind: input, shape index: {}]   ;;  %s167_s1 = inlined_call_operand.hbm [shape: f32[8,256], index: 1, kind: input, shape index: {}]   ;;  %s168_s2 = inlined_call_operand.hbm [shape: f32[8,256], index: 2, kind: output, shape index: {}]  }
   0x1   :  { %8 = vsyncpa [#allocation6], 0 }
   0x2   :  { %9 = vsyncpa [#allocation4], 0  ;;  %s139_s9 = smov [#allocation2]   ;;  %s140_s11 = smov [#allocation5]  }
   0x3   :  { %s16_s10 = sshll.u32 %s139_s9, 4  ;;  %s26_s12 = sshll.u32 %s140_s11, 4  ;;  %s17_s10 = int_to_ptr.vmem [resolvable:$true] %s16_s10  ;;  %s27_s12 = int_to_ptr.vmem [resolvable:$true] %s26_s12 }
   0x4   :  { %s81_s13 = scalar_lea.vmem %s17_s10, 32  ;;  %p86_p1 = scmp.lt.s32.totalorder %s17_s10, %s17_s10 }
   0x5   :  { %p82_p0 = scmp.ne.s32.totalorder %s17_s10, %s81_s13  ;;  %p87_p2 = scmp.lt.s32.totalorder %s81_s13, %s81_s13 }
   0x7   :  { %p88_p3 = por %p87_p2, %p86_p1 }
   0x9   :  { %p89_p4 = pnand %p88_p3, %p82_p0 }
   0xb   :  { %92 = shalt.err (!%p89_p4)
}
   0xc   :  { %19 = dma.hbm_to_vmem [thread:$0]  %s166_s0, 32, %s17_s10, [#allocation3]  }
   0xd   :  { %s101_s16 = scalar_lea.vmem %s27_s12, 256  ;;  %p106_p6 = scmp.lt.s32.totalorder %s27_s12, %s27_s12 }
   0xe   :  { %p102_p5 = scmp.ne.s32.totalorder %s27_s12, %s101_s16  ;;  %p107_p7 = scmp.lt.s32.totalorder %s101_s16, %s101_s16 }
  0x10   :  { %p108_p8 = por %p107_p7, %p106_p6 }
  0x12   :  { %p109_p9 = pnand %p108_p8, %p102_p5 }
  0x14   :  { %112 = shalt.err (!%p109_p9)
}
  0x15   :  { %29 = dma.hbm_to_vmem [thread:$0]  %s167_s1, 256, %s27_s12, [#allocation6]  }
  0x16   :  { %133 = dma.done.wait [#allocation3], 32  }
  0x17   :  { %134 = vsyncadd [#allocation3], 4294967264 }
  0x18   :  { %135 = dma.done.wait [#allocation6], 256  }
  0x19   :  { %136 = vsyncadd [#allocation6], 4294967040  ;;  %v40_v0 = vlaneseq  ;;  %v36_v4 = vld [vmem:[#allocation5] sm:$0xff]  ;;  %v38_v5 = vld [vmem:[#allocation2] sm:$0x3]  ;;  %s141_s0 = smov [#allocation7]  }
  0x1a   :  { %v37_v6 = vld [vmem:[#allocation5 + $0x8] sm:$0xff]  ;;  %s60_s19 = sshll.u32 %s141_s0, 4  ;;  %s61_s19 = int_to_ptr.vmem [resolvable:$true] %s60_s19 }
  0x1b   :  { %v41_v1 = vshrl.u32 %v40_v0, 7  ;;  %s113_s1 = scalar_lea.vmem %s61_s19, 256  ;;  %p118_p11 = scmp.lt.s32.totalorder %s61_s19, %s61_s19 }
  0x1c   :  { %p114_p10 = scmp.ne.s32.totalorder %s61_s19, %s113_s1  ;;  %p119_p12 = scmp.lt.s32.totalorder %s113_s1, %s113_s1 }
  0x1d   :  { %v42_v2 = vsub.s32 0, %v41_v1  ;;  %v46_v3 = vsub.s32 1, %v41_v1 }
  0x1e   :  { %p120_p13 = por %p119_p12, %p118_p11 }
  0x1f   :  { %v43_v7 = vrot.slane %v38_v5, %v42_v2  ;;  %v47_v8 = vrot.slane %v38_v5, %v46_v3 }
  0x20   :  { %p121_p0 = pnand %p120_p13, %p114_p10 }
  0x21   :  { %v50_v9 = vmul.f32 %v43_v7, %v36_v4  ;;  %v51_v10 = vmul.f32 %v47_v8, %v37_v6 }
  0x23   :  { %52 = vst [vmem:[#allocation7] sm:$0xff] %v50_v9  ;;  %53 = vst [vmem:[#allocation7 + $0x8] sm:$0xff] %v51_v10 }
  0x24   :  { %124 = shalt.err (!%p121_p0)
}
  0x25   :  { %63 = dma.vmem_to_hbm [thread:$0]  %s61_s19, 256, %s168_s2, [#allocation4]  }
  0x26   :  { %137 = dma.done.wait [#allocation4], 256  }
  0x27   :  { %138 = vsyncadd [#allocation4], 4294967040 }
  0x28   :  { %67 = vsyncpa [#allocation3], 1 }
  0x29   :  { %68 = vsyncpa [#allocation6], 1 }
  0x2a   :  { %69 = vsyncpa [#allocation4], 1 }

</bundles_post_ra>
